<compile_context>
chip_gen: v6e
topology: v6e:2x2x1
jax: 0.10.0
libtpu: 0.0.40
codegen_flags: <defaults>
</compile_context>

<pallas_src>
import functools
import math

import jax
import jax.numpy as jnp
from jax import lax
from jax.experimental import pallas as pl
from jax.experimental.pallas import tpu as pltpu


def _cross_attn_kernel(h_ref, t_ref, wq_ref, bq_ref, wk_ref, bk_ref,
                       wv_ref, bv_ref, wo_ref, bo_ref, out_ref,
                       q_sc, k_sc, v_sc, ctx_sc,
                       *, num_heads, head_dim, approx_recip, cache_kv):
    f32 = jnp.float32
    cdt = q_sc.dtype

    # ---- K / V projections: full-width (S,E)@(E,E) GEMMs. ----
    def compute_kv():
        txt = t_ref[0]                                                  # (S, E)
        k = jnp.dot(txt, wk_ref[...], preferred_element_type=f32) + bk_ref[...]
        v = jnp.dot(txt, wv_ref[...], preferred_element_type=f32) + bv_ref[...]
        k_sc[...] = k.astype(cdt)
        v_sc[...] = v.astype(cdt)

    if cache_kv:
        # Query-tile axis is 'arbitrary': compute once per batch row, reuse
        # across all query tiles of this row.
        pl.when(pl.program_id(1) == 0)(compute_kv)
    else:
        compute_kv()

    # ---- Q projection: one full-width (tm,E)@(E,E) GEMM (scale pre-folded
    # into the weights / bias on the host).  Stored to VMEM scratch so the
    # per-head loop only holds small lane slices live in registers. ----
    h = h_ref[0]                                                        # (tm, E)
    q_sc[...] = (jnp.dot(h, wq_ref[...], preferred_element_type=f32)
                 + bq_ref[...]).astype(cdt)

    # ---- Per-head attention (the only inherently narrow contractions).
    # Static D-aligned lane slices of the VMEM scratches; each head's result
    # is flushed straight into the ctx slab so live ranges stay bounded. ----
    for hh in range(num_heads):
        lo = hh * head_dim
        qh = q_sc[:, lo:lo + head_dim]                                  # (tm, D)
        kh = k_sc[:, lo:lo + head_dim]                                  # (S, D)
        s = lax.dot_general(qh, kh, (((1,), (1,)), ((), ())),
                            preferred_element_type=f32)                 # (tm, S)
        # Numerically stable softmax, entirely in f32; divide -> EUP recip.
        m = jnp.max(s, axis=-1, keepdims=True)
        e = jnp.exp(s - m)
        inv = pl.reciprocal(jnp.sum(e, axis=-1, keepdims=True),
                            approx=approx_recip)
        p = (e * inv).astype(cdt)
        ctx_sc[:, lo:lo + head_dim] = jnp.dot(
            p, v_sc[:, lo:lo + head_dim],
            preferred_element_type=f32).astype(cdt)

    # ---- Output projection: single full-width (tm,E)@(E,E) GEMM over the
    # assembled ctx slab. ----
    out = jnp.dot(ctx_sc[...], wo_ref[...], preferred_element_type=f32) + bo_ref[...]
    out_ref[0] = out.astype(out_ref.dtype)


def _round_up(x, m):
    return (x + m - 1) // m * m


def _vmem_capacity_bytes():
    # Introspection only; a failure here must not mask kernel errors, so we
    # just fall back to the most conservative per-TensorCore VMEM (v7x).
    try:
        return int(pltpu.get_tpu_info().vmem_capacity_bytes)
    except Exception:
        return 64 * 1024 * 1024


def _pick_query_tile(T, B, vmem_cap):
    """Query tile: multiple of 16 (bf16 sublane packing), capped per chip."""
    max_tm = 512 if vmem_cap >= 96 * 1024 * 1024 else 256
    t16 = _round_up(T, 16)
    tm = min(max_tm, t16)
    # v7x has 2 TensorCores: if B == 1 and everything fits in one tile, split
    # the query axis so the grid exposes >= 2 parallel work items.
    if B == 1 and t16 <= max_tm and t16 >= 32:
        tm = max(16, _round_up(t16 // 2, 16))
    return tm


def _vmem_limit_bytes(tm, S, E, cdt, in_dtype, out_dtype, cap):
    csz = jnp.dtype(cdt).itemsize
    isz = jnp.dtype(in_dtype).itemsize
    osz = jnp.dtype(out_dtype).itemsize
    weights = 2 * (4 * E * E * csz + 4 * E * 4)        # double-buffer reservation
    acts = 2 * tm * E * isz + 2 * S * E * isz + 2 * tm * E * osz
    scratch = (2 * tm * E + 2 * S * E) * csz
    temps = 2 * tm * E * 4 + 4 * tm * _round_up(S, 128) * 4
    need = weights + acts + scratch + temps + (8 << 20)   # + headroom
    limit = max(need, 32 << 20)
    return int(min(limit, cap * 3 // 4))


def clip_cross_attention(hidden_states, text_states, params, *, num_heads,
                         compute_dtype=jnp.bfloat16, approx_recip=None):
    """hidden_states: (B, T, E), text_states: (B, S, E)  ->  (B, T, E)."""
    B, T, E = hidden_states.shape
    _, S, _ = text_states.shape
    H = num_heads
    D = E // H
    assert D * H == E, "embed_dim must be divisible by num_heads"
    scale = D ** (-0.5)
    if approx_recip is None:
        approx_recip = compute_dtype != jnp.float32
    cdt = compute_dtype
    out_dtype = hidden_states.dtype

    # Host-side parameter prep (one-time / constant-foldable):
    #  * transpose so the kernel computes x @ W_t (no in-kernel transposes)
    #  * fold the attention scale into Wq / bq
    #  * cast MXU weight operands to the compute dtype (bf16 by default)
    wq_t = (params["wq"] * scale).T.astype(cdt)        # (E, E)
    wk_t = params["wk"].T.astype(cdt)                  # (E, E)
    wv_t = params["wv"].T.astype(cdt)                  # (E, E)
    wo_t = params["wo"].T.astype(cdt)                  # (E, E)
    bq = (params["bq"] * scale).reshape(1, E).astype(jnp.float32)
    bk = params["bk"].reshape(1, E).astype(jnp.float32)
    bv = params["bv"].reshape(1, E).astype(jnp.float32)
    bo = params["bo"].reshape(1, E).astype(jnp.float32)

    # Pre-cast activations (halves DMA bytes + removes per-step in-kernel casts).
    h_in = hidden_states.astype(cdt)
    t_in = text_states.astype(cdt)

    vmem_cap = _vmem_capacity_bytes()
    tm = _pick_query_tile(T, B, vmem_cap)
    T_pad = _round_up(T, tm)
    if T_pad != T:
        h_in = jnp.pad(h_in, ((0, 0), (0, T_pad - T), (0, 0)))
    nt = T_pad // tm

    # K/V caching requires sequential query-tile order within a batch row, so
    # the t axis must be 'arbitrary'.  If B == 1 (or nt == 1) we keep t
    # 'parallel' so a v7x second TensorCore gets work, recomputing K/V per
    # tile only when strictly necessary.
    cache_kv = (nt == 1) or (B >= 2)
    t_sem = "arbitrary" if (cache_kv and nt > 1) else "parallel"

    vmem_limit = _vmem_limit_bytes(tm, S, E, cdt, cdt, out_dtype, vmem_cap)

    kernel = functools.partial(_cross_attn_kernel, num_heads=H, head_dim=D,
                               approx_recip=approx_recip, cache_kv=cache_kv)

    const2d = lambda b, t: (0, 0)
    out = pl.pallas_call(
        kernel,
        out_shape=jax.ShapeDtypeStruct((B, T_pad, E), out_dtype),
        grid_spec=pltpu.PrefetchScalarGridSpec(
            num_scalar_prefetch=0,
            grid=(B, nt),
            in_specs=[
                pl.BlockSpec((1, tm, E), lambda b, t: (b, t, 0)),   # hidden tile
                pl.BlockSpec((1, S, E), lambda b, t: (b, 0, 0)),    # text (const over t)
                pl.BlockSpec((E, E), const2d), pl.BlockSpec((1, E), const2d),  # q_proj
                pl.BlockSpec((E, E), const2d), pl.BlockSpec((1, E), const2d),  # k_proj
                pl.BlockSpec((E, E), const2d), pl.BlockSpec((1, E), const2d),  # v_proj
                pl.BlockSpec((E, E), const2d), pl.BlockSpec((1, E), const2d),  # out_proj
            ],
            out_specs=pl.BlockSpec((1, tm, E), lambda b, t: (b, t, 0)),
            scratch_shapes=[
                pltpu.VMEM((tm, E), cdt),   # q
                pltpu.VMEM((S, E), cdt),    # k (cached across query tiles)
                pltpu.VMEM((S, E), cdt),    # v (cached across query tiles)
                pltpu.VMEM((tm, E), cdt),   # ctx slab
            ],
        ),
        compiler_params=pltpu.CompilerParams(
            dimension_semantics=("parallel", t_sem),
            vmem_limit_bytes=vmem_limit,
        ),
    )(h_in, t_in, wq_t, bq, wk_t, bk, wv_t, bv, wo_t, bo)

    if T_pad != T:
        out = out[:, :T, :]
    return out


def _reference(hidden_states, text_states, params, *, num_heads):
    """Plain-JAX f32 reference mirroring the PyTorch forward (eval mode)."""
    B, T, E = hidden_states.shape
    S = text_states.shape[1]
    D = E // num_heads
    scale = D ** (-0.5)

    def lin(x, w, b):
        return x @ w.T + b

    q = lin(hidden_states, params["wq"], params["bq"]) * scale
    k = lin(text_states, params["wk"], params["bk"])
    v = lin(text_states, params["wv"], params["bv"])

    def split_heads(x, L):
        return x.reshape(B, L, num_heads, D).transpose(0, 2, 1, 3)

    qh, kh, vh = split_heads(q, T), split_heads(k, S), split_heads(v, S)
    w = jnp.einsum("bhtd,bhsd->bhts", qh, kh)
    p = jax.nn.softmax(w, axis=-1)
    ctx = jnp.einsum("bhts,bhsd->bhtd", p, vh)
    ctx = ctx.transpose(0, 2, 1, 3).reshape(B, T, E)
    return lin(ctx, params["wo"], params["bo"])


if __name__ == "__main__":
    # Small config: hidden_size=32, num_attention_heads=4 -> head_dim=8
    B, T, S, E, H = 2, 16, 8, 32, 4

    key = jax.random.PRNGKey(0)
    ks = jax.random.split(key, 10)
    hidden_states = jax.random.normal(ks[0], (B, T, E), jnp.float32)
    text_states = jax.random.normal(ks[1], (B, S, E), jnp.float32)

    std = 1.0 / math.sqrt(E)
    params = {
        "wq": jax.random.normal(ks[2], (E, E), jnp.float32) * std,
        "bq": jax.random.normal(ks[3], (E,), jnp.float32) * std,
        "wk": jax.random.normal(ks[4], (E, E), jnp.float32) * std,
        "bk": jax.random.normal(ks[5], (E,), jnp.float32) * std,
        "wv": jax.random.normal(ks[6], (E, E), jnp.float32) * std,
        "bv": jax.random.normal(ks[7], (E,), jnp.float32) * std,
        "wo": jax.random.normal(ks[8], (E, E), jnp.float32) * std,
        "bo": jax.random.normal(ks[9], (E,), jnp.float32) * std,
    }

    ref = _reference(hidden_states, text_states, params, num_heads=H)

    # Exact-precision path (f32 MXU operands, exact softmax divide): tight check.
    out_f32 = clip_cross_attention(hidden_states, text_states, params,
                                   num_heads=H, compute_dtype=jnp.float32)
    out_f32 = jax.block_until_ready(out_f32)
    assert out_f32.shape == (B, T, E)
    assert jnp.allclose(out_f32, ref, atol=1e-4, rtol=1e-4), "f32 path mismatch"

    # Default optimized path (bf16 MXU operands, f32 accumulation & softmax,
    # approx EUP reciprocal): bf16-level tolerance vs the f32 reference.
    out = clip_cross_attention(hidden_states, text_states, params, num_heads=H)
    out = jax.block_until_ready(out)
    assert out.shape == (B, T, E)
    assert jnp.allclose(out, ref, atol=3e-2, rtol=3e-2), "bf16 path mismatch"

    print("KERNEL_OK")
</pallas_src>

<mosaic_0001>
module attributes {stable_mosaic.version = 11 : i64} {
  func.func @_cross_attn_kernel(%arg0: i32, %arg1: i32, %arg2: memref<1x16x32xf32, #tpu.memory_space<vmem>>, %arg3: memref<1x8x32xf32, #tpu.memory_space<vmem>>, %arg4: memref<32x32xf32, #tpu.memory_space<vmem>>, %arg5: memref<1x32xf32, #tpu.memory_space<vmem>>, %arg6: memref<32x32xf32, #tpu.memory_space<vmem>>, %arg7: memref<1x32xf32, #tpu.memory_space<vmem>>, %arg8: memref<32x32xf32, #tpu.memory_space<vmem>>, %arg9: memref<1x32xf32, #tpu.memory_space<vmem>>, %arg10: memref<32x32xf32, #tpu.memory_space<vmem>>, %arg11: memref<1x32xf32, #tpu.memory_space<vmem>>, %arg12: memref<1x16x32xf32, #tpu.memory_space<vmem>>, %arg13: memref<16x32xf32, #tpu.memory_space<vmem>>, %arg14: memref<8x32xf32, #tpu.memory_space<vmem>>, %arg15: memref<8x32xf32, #tpu.memory_space<vmem>>, %arg16: memref<16x32xf32, #tpu.memory_space<vmem>>) attributes {dimension_semantics = [#tpu.dimension_semantics<parallel>, #tpu.dimension_semantics<parallel>], iteration_bounds = array<i64: 2, 1>, scalar_prefetch = 0 : i64, scratch_operands = 4 : i64, tpu.core_type = #tpu.core_type<tc>, window_params = [{transform_indices = @transform_0, window_bounds = array<i64: 1, 16, 32>}, {transform_indices = @transform_1, window_bounds = array<i64: 1, 8, 32>}, {pipeline_mode = #tpu.pipeline_mode<synchronous>, transform_indices = @transform_2, window_bounds = array<i64: 32, 32>}, {pipeline_mode = #tpu.pipeline_mode<synchronous>, transform_indices = @transform_3, window_bounds = array<i64: 1, 32>}, {pipeline_mode = #tpu.pipeline_mode<synchronous>, transform_indices = @transform_4, window_bounds = array<i64: 32, 32>}, {pipeline_mode = #tpu.pipeline_mode<synchronous>, transform_indices = @transform_5, window_bounds = array<i64: 1, 32>}, {pipeline_mode = #tpu.pipeline_mode<synchronous>, transform_indices = @transform_6, window_bounds = array<i64: 32, 32>}, {pipeline_mode = #tpu.pipeline_mode<synchronous>, transform_indices = @transform_7, window_bounds = array<i64: 1, 32>}, {pipeline_mode = #tpu.pipeline_mode<synchronous>, transform_indices = @transform_8, window_bounds = array<i64: 32, 32>}, {pipeline_mode = #tpu.pipeline_mode<synchronous>, transform_indices = @transform_9, window_bounds = array<i64: 1, 32>}, {transform_indices = @transform_10, window_bounds = array<i64: 1, 16, 32>}]} {
    %c0_i32 = arith.constant 0 : i32
    %0 = arith.cmpi eq, %arg1, %c0_i32 : i32
    %1 = arith.extui %0 : i1 to i32
    %c0_i32_0 = arith.constant 0 : i32
    %2 = arith.cmpi ne, %1, %c0_i32_0 : i32
    scf.if %2 {
      %c0_64 = arith.constant 0 : index
      %c0_65 = arith.constant 0 : index
      %c0_66 = arith.constant 0 : index
      %84 = vector.load %arg3[%c0_64, %c0_65, %c0_66] : memref<1x8x32xf32, #tpu.memory_space<vmem>>, vector<1x8x32xf32>
      %85 = vector.shape_cast %84 : vector<1x8x32xf32> to vector<8x32xf32>
      %c0_67 = arith.constant 0 : index
      %c0_68 = arith.constant 0 : index
      %86 = vector.load %arg6[%c0_67, %c0_68] : memref<32x32xf32, #tpu.memory_space<vmem>>, vector<32x32xf32>
      %cst_69 = arith.constant dense<0.000000e+00> : vector<8x32xf32>
      %87 = tpu.matmul %85, %86, %cst_69 {dimension_numbers = #tpu.dot_dimension_numbers<[1], [0], [0], [1], [0, 0, 1, 1], [], []>} : vector<8x32xf32>, vector<32x32xf32>, vector<8x32xf32> -> vector<8x32xf32>
      %c0_70 = arith.constant 0 : index
      %c0_71 = arith.constant 0 : index
      %88 = vector.load %arg7[%c0_70, %c0_71] : memref<1x32xf32, #tpu.memory_space<vmem>>, vector<1x32xf32>
      %89 = vector.broadcast %88 : vector<1x32xf32> to vector<8x32xf32>
      %90 = arith.addf %87, %89 : vector<8x32xf32>
      %c0_72 = arith.constant 0 : index
      %c0_73 = arith.constant 0 : index
      %91 = vector.load %arg8[%c0_72, %c0_73] : memref<32x32xf32, #tpu.memory_space<vmem>>, vector<32x32xf32>
      %cst_74 = arith.constant dense<0.000000e+00> : vector<8x32xf32>
      %92 = tpu.matmul %85, %91, %cst_74 {dimension_numbers = #tpu.dot_dimension_numbers<[1], [0], [0], [1], [0, 0, 1, 1], [], []>} : vector<8x32xf32>, vector<32x32xf32>, vector<8x32xf32> -> vector<8x32xf32>
      %c0_75 = arith.constant 0 : index
      %c0_76 = arith.constant 0 : index
      %93 = vector.load %arg9[%c0_75, %c0_76] : memref<1x32xf32, #tpu.memory_space<vmem>>, vector<1x32xf32>
      %94 = vector.broadcast %93 : vector<1x32xf32> to vector<8x32xf32>
      %95 = arith.addf %92, %94 : vector<8x32xf32>
      %c0_77 = arith.constant 0 : index
      %c0_78 = arith.constant 0 : index
      %96 = vector.load %arg14[%c0_77, %c0_78] : memref<8x32xf32, #tpu.memory_space<vmem>>, vector<8x32xf32>
      tpu.vector_store %arg14[%c0_77, %c0_78], %90 {strides = array<i32>} : memref<8x32xf32, #tpu.memory_space<vmem>>, vector<8x32xf32>,
      %c0_79 = arith.constant 0 : index
      %c0_80 = arith.constant 0 : index
      %97 = vector.load %arg15[%c0_79, %c0_80] : memref<8x32xf32, #tpu.memory_space<vmem>>, vector<8x32xf32>
      tpu.vector_store %arg15[%c0_79, %c0_80], %95 {strides = array<i32>} : memref<8x32xf32, #tpu.memory_space<vmem>>, vector<8x32xf32>,
    } else {
    }
    %c0 = arith.constant 0 : index
    %c0_1 = arith.constant 0 : index
    %c0_2 = arith.constant 0 : index
    %3 = vector.load %arg2[%c0, %c0_1, %c0_2] : memref<1x16x32xf32, #tpu.memory_space<vmem>>, vector<1x16x32xf32>
    %4 = vector.shape_cast %3 : vector<1x16x32xf32> to vector<16x32xf32>
    %c0_3 = arith.constant 0 : index
    %c0_4 = arith.constant 0 : index
    %5 = vector.load %arg4[%c0_3, %c0_4] : memref<32x32xf32, #tpu.memory_space<vmem>>, vector<32x32xf32>
    %cst = arith.constant dense<0.000000e+00> : vector<16x32xf32>
    %6 = tpu.matmul %4, %5, %cst {dimension_numbers = #tpu.dot_dimension_numbers<[1], [0], [0], [1], [0, 0, 1, 1], [], []>} : vector<16x32xf32>, vector<32x32xf32>, vector<16x32xf32> -> vector<16x32xf32>
    %c0_5 = arith.constant 0 : index
    %c0_6 = arith.constant 0 : index
    %7 = vector.load %arg5[%c0_5, %c0_6] : memref<1x32xf32, #tpu.memory_space<vmem>>, vector<1x32xf32>
    %8 = vector.broadcast %7 : vector<1x32xf32> to vector<16x32xf32>
    %9 = arith.addf %6, %8 : vector<16x32xf32>
    %c0_7 = arith.constant 0 : index
    %c0_8 = arith.constant 0 : index
    %10 = vector.load %arg13[%c0_7, %c0_8] : memref<16x32xf32, #tpu.memory_space<vmem>>, vector<16x32xf32>
    tpu.vector_store %arg13[%c0_7, %c0_8], %9 {strides = array<i32>} : memref<16x32xf32, #tpu.memory_space<vmem>>, vector<16x32xf32>,
    %c0_9 = arith.constant 0 : index
    %c0_10 = arith.constant 0 : index
    %11 = vector.load %arg13[%c0_9, %c0_10] : memref<16x32xf32, #tpu.memory_space<vmem>>, vector<16x8xf32>
    %c0_11 = arith.constant 0 : index
    %c0_12 = arith.constant 0 : index
    %12 = vector.load %arg14[%c0_11, %c0_12] : memref<8x32xf32, #tpu.memory_space<vmem>>, vector<8x8xf32>
    %cst_13 = arith.constant dense<0.000000e+00> : vector<16x8xf32>
    %13 = tpu.matmul %11, %12, %cst_13 {dimension_numbers = #tpu.dot_dimension_numbers<[1], [1], [0], [0], [0, 0, 1, 0], [], []>} : vector<16x8xf32>, vector<8x8xf32>, vector<16x8xf32> -> vector<16x8xf32>
    %cst_14 = arith.constant dense<0xFF800000> : vector<16xf32>
    %14 = vector.multi_reduction <maximumf>, %13, %cst_14 [1] : vector<16x8xf32> to vector<16xf32>
    %15 = vector.shape_cast %14 : vector<16xf32> to vector<16x1xf32>
    %16 = vector.broadcast %15 : vector<16x1xf32> to vector<16x8xf32>
    %17 = arith.subf %13, %16 : vector<16x8xf32>
    %18 = math.exp %17 : vector<16x8xf32>
    %cst_15 = arith.constant dense<0.000000e+00> : vector<16xf32>
    %19 = vector.multi_reduction <add>, %18, %cst_15 [1] : vector<16x8xf32> to vector<16xf32>
    %20 = vector.shape_cast %19 : vector<16xf32> to vector<16x1xf32>
    %21 = tpu.reciprocal %20 : vector<16x1xf32> -> vector<16x1xf32>
    %22 = vector.broadcast %21 : vector<16x1xf32> to vector<16x8xf32>
    %23 = arith.mulf %18, %22 : vector<16x8xf32>
    %c0_16 = arith.constant 0 : index
    %c0_17 = arith.constant 0 : index
    %24 = vector.load %arg15[%c0_16, %c0_17] : memref<8x32xf32, #tpu.memory_space<vmem>>, vector<8x8xf32>
    %cst_18 = arith.constant dense<0.000000e+00> : vector<16x8xf32>
    %25 = tpu.matmul %23, %24, %cst_18 {dimension_numbers = #tpu.dot_dimension_numbers<[1], [0], [0], [1], [0, 0, 1, 1], [], []>} : vector<16x8xf32>, vector<8x8xf32>, vector<16x8xf32> -> vector<16x8xf32>
    %c0_19 = arith.constant 0 : index
    %c0_20 = arith.constant 0 : index
    %26 = vector.load %arg16[%c0_19, %c0_20] : memref<16x32xf32, #tpu.memory_space<vmem>>, vector<16x8xf32>
    tpu.vector_store %arg16[%c0_19, %c0_20], %25 {strides = array<i32>} : memref<16x32xf32, #tpu.memory_space<vmem>>, vector<16x8xf32>,
    %c0_21 = arith.constant 0 : index
    %c8 = arith.constant 8 : index
    %27 = vector.load %arg13[%c0_21, %c8] : memref<16x32xf32, #tpu.memory_space<vmem>>, vector<16x8xf32>
    %c0_22 = arith.constant 0 : index
    %c8_23 = arith.constant 8 : index
    %28 = vector.load %arg14[%c0_22, %c8_23] : memref<8x32xf32, #tpu.memory_space<vmem>>, vector<8x8xf32>
    %cst_24 = arith.constant dense<0.000000e+00> : vector<16x8xf32>
    %29 = tpu.matmul %27, %28, %cst_24 {dimension_numbers = #tpu.dot_dimension_numbers<[1], [1], [0], [0], [0, 0, 1, 0], [], []>} : vector<16x8xf32>, vector<8x8xf32>, vector<16x8xf32> -> vector<16x8xf32>
    %cst_25 = arith.constant dense<0xFF800000> : vector<16xf32>
    %30 = vector.multi_reduction <maximumf>, %29, %cst_25 [1] : vector<16x8xf32> to vector<16xf32>
    %31 = vector.shape_cast %30 : vector<16xf32> to vector<16x1xf32>
    %32 = vector.broadcast %31 : vector<16x1xf32> to vector<16x8xf32>
    %33 = arith.subf %29, %32 : vector<16x8xf32>
    %34 = math.exp %33 : vector<16x8xf32>
    %cst_26 = arith.constant dense<0.000000e+00> : vector<16xf32>
    %35 = vector.multi_reduction <add>, %34, %cst_26 [1] : vector<16x8xf32> to vector<16xf32>
    %36 = vector.shape_cast %35 : vector<16xf32> to vector<16x1xf32>
    %37 = tpu.reciprocal %36 : vector<16x1xf32> -> vector<16x1xf32>
    %38 = vector.broadcast %37 : vector<16x1xf32> to vector<16x8xf32>
    %39 = arith.mulf %34, %38 : vector<16x8xf32>
    %c0_27 = arith.constant 0 : index
    %c8_28 = arith.constant 8 : index
    %40 = vector.load %arg15[%c0_27, %c8_28] : memref<8x32xf32, #tpu.memory_space<vmem>>, vector<8x8xf32>
    %cst_29 = arith.constant dense<0.000000e+00> : vector<16x8xf32>
    %41 = tpu.matmul %39, %40, %cst_29 {dimension_numbers = #tpu.dot_dimension_numbers<[1], [0], [0], [1], [0, 0, 1, 1], [], []>} : vector<16x8xf32>, vector<8x8xf32>, vector<16x8xf32> -> vector<16x8xf32>
    %c0_30 = arith.constant 0 : index
    %c8_31 = arith.constant 8 : index
    %42 = vector.load %arg16[%c0_30, %c8_31] : memref<16x32xf32, #tpu.memory_space<vmem>>, vector<16x8xf32>
    tpu.vector_store %arg16[%c0_30, %c8_31], %41 {strides = array<i32>} : memref<16x32xf32, #tpu.memory_space<vmem>>, vector<16x8xf32>,
    %c0_32 = arith.constant 0 : index
    %c16 = arith.constant 16 : index
    %43 = vector.load %arg13[%c0_32, %c16] : memref<16x32xf32, #tpu.memory_space<vmem>>, vector<16x8xf32>
    %c0_33 = arith.constant 0 : index
    %c16_34 = arith.constant 16 : index
    %44 = vector.load %arg14[%c0_33, %c16_34] : memref<8x32xf32, #tpu.memory_space<vmem>>, vector<8x8xf32>
    %cst_35 = arith.constant dense<0.000000e+00> : vector<16x8xf32>
    %45 = tpu.matmul %43, %44, %cst_35 {dimension_numbers = #tpu.dot_dimension_numbers<[1], [1], [0], [0], [0, 0, 1, 0], [], []>} : vector<16x8xf32>, vector<8x8xf32>, vector<16x8xf32> -> vector<16x8xf32>
    %cst_36 = arith.constant dense<0xFF800000> : vector<16xf32>
    %46 = vector.multi_reduction <maximumf>, %45, %cst_36 [1] : vector<16x8xf32> to vector<16xf32>
    %47 = vector.shape_cast %46 : vector<16xf32> to vector<16x1xf32>
    %48 = vector.broadcast %47 : vector<16x1xf32> to vector<16x8xf32>
    %49 = arith.subf %45, %48 : vector<16x8xf32>
    %50 = math.exp %49 : vector<16x8xf32>
    %cst_37 = arith.constant dense<0.000000e+00> : vector<16xf32>
    %51 = vector.multi_reduction <add>, %50, %cst_37 [1] : vector<16x8xf32> to vector<16xf32>
    %52 = vector.shape_cast %51 : vector<16xf32> to vector<16x1xf32>
    %53 = tpu.reciprocal %52 : vector<16x1xf32> -> vector<16x1xf32>
    %54 = vector.broadcast %53 : vector<16x1xf32> to vector<16x8xf32>
    %55 = arith.mulf %50, %54 : vector<16x8xf32>
    %c0_38 = arith.constant 0 : index
    %c16_39 = arith.constant 16 : index
    %56 = vector.load %arg15[%c0_38, %c16_39] : memref<8x32xf32, #tpu.memory_space<vmem>>, vector<8x8xf32>
    %cst_40 = arith.constant dense<0.000000e+00> : vector<16x8xf32>
    %57 = tpu.matmul %55, %56, %cst_40 {dimension_numbers = #tpu.dot_dimension_numbers<[1], [0], [0], [1], [0, 0, 1, 1], [], []>} : vector<16x8xf32>, vector<8x8xf32>, vector<16x8xf32> -> vector<16x8xf32>
    %c0_41 = arith.constant 0 : index
    %c16_42 = arith.constant 16 : index
    %58 = vector.load %arg16[%c0_41, %c16_42] : memref<16x32xf32, #tpu.memory_space<vmem>>, vector<16x8xf32>
    tpu.vector_store %arg16[%c0_41, %c16_42], %57 {strides = array<i32>} : memref<16x32xf32, #tpu.memory_space<vmem>>, vector<16x8xf32>,
    %c0_43 = arith.constant 0 : index
    %c24 = arith.constant 24 : index
    %59 = vector.load %arg13[%c0_43, %c24] : memref<16x32xf32, #tpu.memory_space<vmem>>, vector<16x8xf32>
    %c0_44 = arith.constant 0 : index
    %c24_45 = arith.constant 24 : index
    %60 = vector.load %arg14[%c0_44, %c24_45] : memref<8x32xf32, #tpu.memory_space<vmem>>, vector<8x8xf32>
    %cst_46 = arith.constant dense<0.000000e+00> : vector<16x8xf32>
    %61 = tpu.matmul %59, %60, %cst_46 {dimension_numbers = #tpu.dot_dimension_numbers<[1], [1], [0], [0], [0, 0, 1, 0], [], []>} : vector<16x8xf32>, vector<8x8xf32>, vector<16x8xf32> -> vector<16x8xf32>
    %cst_47 = arith.constant dense<0xFF800000> : vector<16xf32>
    %62 = vector.multi_reduction <maximumf>, %61, %cst_47 [1] : vector<16x8xf32> to vector<16xf32>
    %63 = vector.shape_cast %62 : vector<16xf32> to vector<16x1xf32>
    %64 = vector.broadcast %63 : vector<16x1xf32> to vector<16x8xf32>
    %65 = arith.subf %61, %64 : vector<16x8xf32>
    %66 = math.exp %65 : vector<16x8xf32>
    %cst_48 = arith.constant dense<0.000000e+00> : vector<16xf32>
    %67 = vector.multi_reduction <add>, %66, %cst_48 [1] : vector<16x8xf32> to vector<16xf32>
    %68 = vector.shape_cast %67 : vector<16xf32> to vector<16x1xf32>
    %69 = tpu.reciprocal %68 : vector<16x1xf32> -> vector<16x1xf32>
    %70 = vector.broadcast %69 : vector<16x1xf32> to vector<16x8xf32>
    %71 = arith.mulf %66, %70 : vector<16x8xf32>
    %c0_49 = arith.constant 0 : index
    %c24_50 = arith.constant 24 : index
    %72 = vector.load %arg15[%c0_49, %c24_50] : memref<8x32xf32, #tpu.memory_space<vmem>>, vector<8x8xf32>
    %cst_51 = arith.constant dense<0.000000e+00> : vector<16x8xf32>
    %73 = tpu.matmul %71, %72, %cst_51 {dimension_numbers = #tpu.dot_dimension_numbers<[1], [0], [0], [1], [0, 0, 1, 1], [], []>} : vector<16x8xf32>, vector<8x8xf32>, vector<16x8xf32> -> vector<16x8xf32>
    %c0_52 = arith.constant 0 : index
    %c24_53 = arith.constant 24 : index
    %74 = vector.load %arg16[%c0_52, %c24_53] : memref<16x32xf32, #tpu.memory_space<vmem>>, vector<16x8xf32>
    tpu.vector_store %arg16[%c0_52, %c24_53], %73 {strides = array<i32>} : memref<16x32xf32, #tpu.memory_space<vmem>>, vector<16x8xf32>,
    %c0_54 = arith.constant 0 : index
    %c0_55 = arith.constant 0 : index
    %75 = vector.load %arg16[%c0_54, %c0_55] : memref<16x32xf32, #tpu.memory_space<vmem>>, vector<16x32xf32>
    %c0_56 = arith.constant 0 : index
    %c0_57 = arith.constant 0 : index
    %76 = vector.load %arg10[%c0_56, %c0_57] : memref<32x32xf32, #tpu.memory_space<vmem>>, vector<32x32xf32>
    %cst_58 = arith.constant dense<0.000000e+00> : vector<16x32xf32>
    %77 = tpu.matmul %75, %76, %cst_58 {dimension_numbers = #tpu.dot_dimension_numbers<[1], [0], [0], [1], [0, 0, 1, 1], [], []>} : vector<16x32xf32>, vector<32x32xf32>, vector<16x32xf32> -> vector<16x32xf32>
    %c0_59 = arith.constant 0 : index
    %c0_60 = arith.constant 0 : index
    %78 = vector.load %arg11[%c0_59, %c0_60] : memref<1x32xf32, #tpu.memory_space<vmem>>, vector<1x32xf32>
    %79 = vector.broadcast %78 : vector<1x32xf32> to vector<16x32xf32>
    %80 = arith.addf %77, %79 : vector<16x32xf32>
    %c0_61 = arith.constant 0 : index
    %c0_62 = arith.constant 0 : index
    %c0_63 = arith.constant 0 : index
    %81 = vector.load %arg12[%c0_61, %c0_62, %c0_63] : memref<1x16x32xf32, #tpu.memory_space<vmem>>, vector<1x16x32xf32>
    %82 = vector.shape_cast %81 : vector<1x16x32xf32> to vector<16x32xf32>
    %83 = vector.shape_cast %80 : vector<16x32xf32> to vector<1x16x32xf32>
    tpu.vector_store %arg12[%c0_61, %c0_62, %c0_63], %83 {strides = array<i32>} : memref<1x16x32xf32, #tpu.memory_space<vmem>>, vector<1x16x32xf32>,
    return
  }
  func.func @transform_0(%arg0: i32, %arg1: i32) -> (i32, i32, i32) {
    %c0_i32 = arith.constant 0 : i32
    %c0_i32_0 = arith.constant 0 : i32
    return %arg0, %arg1, %c0_i32 : i32, i32, i32
  }
  func.func @transform_1(%arg0: i32, %arg1: i32) -> (i32, i32, i32) {
    %c0_i32 = arith.constant 0 : i32
    %c0_i32_0 = arith.constant 0 : i32
    %c0_i32_1 = arith.constant 0 : i32
    return %arg0, %c0_i32, %c0_i32_0 : i32, i32, i32
  }
  func.func @transform_2(%arg0: i32, %arg1: i32) -> (i32, i32) {
    %c0_i32 = arith.constant 0 : i32
    %c0_i32_0 = arith.constant 0 : i32
    %c0_i32_1 = arith.constant 0 : i32
    return %c0_i32, %c0_i32_0 : i32, i32
  }
  func.func @transform_3(%arg0: i32, %arg1: i32) -> (i32, i32) {
    %c0_i32 = arith.constant 0 : i32
    %c0_i32_0 = arith.constant 0 : i32
    %c0_i32_1 = arith.constant 0 : i32
    return %c0_i32, %c0_i32_0 : i32, i32
  }
  func.func @transform_4(%arg0: i32, %arg1: i32) -> (i32, i32) {
    %c0_i32 = arith.constant 0 : i32
    %c0_i32_0 = arith.constant 0 : i32
    %c0_i32_1 = arith.constant 0 : i32
    return %c0_i32, %c0_i32_0 : i32, i32
  }
  func.func @transform_5(%arg0: i32, %arg1: i32) -> (i32, i32) {
    %c0_i32 = arith.constant 0 : i32
    %c0_i32_0 = arith.constant 0 : i32
    %c0_i32_1 = arith.constant 0 : i32
    return %c0_i32, %c0_i32_0 : i32, i32
  }
  func.func @transform_6(%arg0: i32, %arg1: i32) -> (i32, i32) {
    %c0_i32 = arith.constant 0 : i32
    %c0_i32_0 = arith.constant 0 : i32
    %c0_i32_1 = arith.constant 0 : i32
    return %c0_i32, %c0_i32_0 : i32, i32
  }
  func.func @transform_7(%arg0: i32, %arg1: i32) -> (i32, i32) {
    %c0_i32 = arith.constant 0 : i32
    %c0_i32_0 = arith.constant 0 : i32
    %c0_i32_1 = arith.constant 0 : i32
    return %c0_i32, %c0_i32_0 : i32, i32
  }
  func.func @transform_8(%arg0: i32, %arg1: i32) -> (i32, i32) {
    %c0_i32 = arith.constant 0 : i32
    %c0_i32_0 = arith.constant 0 : i32
    %c0_i32_1 = arith.constant 0 : i32
    return %c0_i32, %c0_i32_0 : i32, i32
  }
  func.func @transform_9(%arg0: i32, %arg1: i32) -> (i32, i32) {
    %c0_i32 = arith.constant 0 : i32
    %c0_i32_0 = arith.constant 0 : i32
    %c0_i32_1 = arith.constant 0 : i32
    return %c0_i32, %c0_i32_0 : i32, i32
  }
  func.func @transform_10(%arg0: i32, %arg1: i32) -> (i32, i32, i32) {
    %c0_i32 = arith.constant 0 : i32
    %c0_i32_0 = arith.constant 0 : i32
    return %arg0, %arg1, %c0_i32 : i32, i32, i32
  }
}

</mosaic_0001>

<bundles_post_ra>
// kernel: tpu_custom_call.1
= control target key start
LH: loop header
LB: loop body
LE: loop exit
PB: predicated region body
PF: predicated region fallthrough
CT: control target
= control target key end

     0   :  { %s2866_s0 = inlined_call_operand.hbm [shape: f32[2,16,32], index: 0, kind: input, shape index: {}]   ;;  %s2867_s1 = inlined_call_operand.hbm [shape: f32[2,8,32], index: 1, kind: input, shape index: {}]   ;;  %s2868_s2 = inlined_call_operand.hbm [shape: f32[32,32], index: 2, kind: input, shape index: {}]   ;;  %s2869_s3 = inlined_call_operand.vmem [shape: f32[1,32], index: 3, kind: input, shape index: {}]   ;;  %s2870_s4 = inlined_call_operand.hbm [shape: f32[32,32], index: 4, kind: input, shape index: {}]   ;;  %s2871_s5 = inlined_call_operand.vmem [shape: f32[1,32], index: 5, kind: input, shape index: {}]   ;;  %s2872_s6 = inlined_call_operand.hbm [shape: f32[32,32], index: 6, kind: input, shape index: {}]   ;;  %s2873_s7 = inlined_call_operand.vmem [shape: f32[1,32], index: 7, kind: input, shape index: {}]   ;;  %s2874_s8 = inlined_call_operand.hbm [shape: f32[32,32], index: 8, kind: input, shape index: {}]   ;;  %s2875_s9 = inlined_call_operand.vmem [shape: f32[1,32], index: 9, kind: input, shape index: {}]   ;;  %s2876_s10 = inlined_call_operand.hbm [shape: f32[2,16,32], index: 10, kind: output, shape index: {}]  }
   0x1   :  { %2887 = sst [smem:[#allocation30_spill]] %s2866_s0 }
   0x2   :  { %2888 = sst [smem:[#allocation31_spill]] %s2868_s2 }
   0x3   :  { %2889 = sst [smem:[#allocation32_spill]] %s2870_s4 }
   0x4   :  { %2890 = sst [smem:[#allocation33_spill]] %s2872_s6 }
   0x5   :  { %2891 = sst [smem:[#allocation34_spill]] %s2874_s8 }
   0x6   :  { %2892 = sst [smem:[#allocation35_spill]] %s2876_s10 }
   0x7   :  { %15 = vsyncpa [#allocation7], 0 }
   0x8   :  { %17 = vsyncpa [#allocation7 + $0x1], 0 }
   0x9   :  { %18 = vsyncpa [#allocation10], 0 }
   0xa   :  { %20 = vsyncpa [#allocation10 + $0x1], 0 }
   0xb   :  { %21 = vsyncpa [#allocation13], 0 }
   0xc   :  { %22 = vsyncpa [#allocation16], 0 }
   0xd   :  { %23 = vsyncpa [#allocation8], 0 }
   0xe   :  { %25 = vsyncpa [#allocation8 + $0x1], 0  ;;  %s2523_s13 = smov 0   ;;  %s2525_s14 = smov 0  }
   0xf   :  { %s2527_s15 = smov 0   ;;  %s2529_s16 = smov 0  }
  0x10   :  { %s2531_s17 = smov 0   ;;  %s2533_s18 = smov 0  }
  0x11 LB: > { %2893 = sst [smem:[#allocation24_spill]] %s2428_s13  ;;  %s2554_s19 = sadd.s32 4294967295, %s2448_s18   ;;  %s2448_s18 = sphi %s2533_s18, %s31_s18   ;;  %s2444_s17 = sphi %s2531_s17, %s2929_s17   ;;  %s2440_s16 = sphi %s2529_s16, %s2928_s16   ;;  %s2436_s15 = sphi %s2527_s15, %s2924_s15   ;;  %s2432_s14 = sphi %s2525_s14, %s2927_s14   ;;  %s2428_s13 = sphi %s2523_s13, %s2926_s13  }
  0x12   : > { %2894 = sst [smem:[#allocation25_spill]] %s2436_s15  ;;  %s1854_s20 = sadd.s32 4294967294, %s2448_s18  }
  0x13   : > { %2895 = sst [smem:[#allocation26_spill]] %s2448_s18  ;;  %p65_p0 = scmp.ne.s32.totalorder %s2432_s14, %s2428_s13 }
  0x14   : > { %p2878_p1 = scmp.eq.s32.totalorder %s2554_s19, 0  ;;  %p285_p2 = scmp.eq.s32.totalorder %s2554_s19, 1 }
  0x15   : > { %p291_p3 = scmp.eq.s32.totalorder %s1854_s20, 1  ;;  %p1855_p5 = scmp.ge.s32.totalorder %s2448_s18, 1 }
  0x16   : > { %p2563_p4 = por %p2878_p1, %p65_p0  ;;  %p298_p7 = scmp.lt.s32.totalorder %s2448_s18, 3 }
  0x17   : > { %p2568_p6 = por %p291_p3, %p65_p0  ;;  %s2450_s24 = smov [#allocation11]  }
  0x18   : > { %p2573_p8 = pnand %p1855_p5, %p298_p7  ;;  %s310_s25 = sshll.u32 %s2450_s24, 4  ;;  %s311_s25 = int_to_ptr.vmem [resolvable:$true] %s310_s25 }
  0x19   : > { %s2897_s22 = scalar_select %p2568_p6, 1, 0 }
  0x1a   : > { %p2063_p9 = pneg %p2573_p8  ;;  %s2451_s27 = smov [#allocation12]  }
  0x1b   : > { %2898 = sst [smem:[#allocation27_spill]] %s2897_s22  ;;  %s326_s28 = sshll.u32 %s2451_s27, 4  ;;  %s327_s28 = int_to_ptr.vmem [resolvable:$true] %s326_s28 }
  0x1c   : > { %p2582_p11 = pnand %p2063_p9, %p2878_p1  ;;  %s2452_s29 = smov [#allocation14]  }
  0x1d   : > { %s342_s30 = sshll.u32 %s2452_s29, 4  ;;  %s2203_s11 = scalar_lea.vmem %s311_s25, 512  ;;  %s343_s30 = int_to_ptr.vmem [resolvable:$true] %s342_s30 }
  0x1e   : > { %p2194_p12 = pneg %p2582_p11  ;;  %p2204_p13 = scmp.ne.s32.totalorder %s311_s25, %s2203_s11 }
  0x1f   : > { %p2211_p5 = scmp.lt.s32.totalorder %s311_s25, %s311_s25  ;;  %p2212_p7 = scmp.lt.s32.totalorder %s2203_s11, %s2203_s11 }
  0x20   : > { %p2206_p0 = pnand %p2204_p13, %p2194_p12 }
  0x21   : > { %p2213_p9 = por %p2212_p7, %p2211_p5 }
  0x22   : > { %p2207_p3 = pneg %p2206_p0 }
  0x24   : > { %p2214_p10 = pnand %p2213_p9, %p2207_p3 }
  0x26   : > { %2217 = shalt.err (!%p2214_p10)
}
  0x27   : > { %s2879_s12 = smov 128   ;;  %s2880_s20 = smov 8  }
  0x28   : > { %s2901_s2 = sld [smem:[#allocation31_spill]]  ;;  %s2229_s29 = scalar_lea.vmem %s327_s28, 512 }
  0x29   : > { %p2230_p13 = scmp.ne.s32.totalorder %s327_s28, %s2229_s29  ;;  %p2237_p3 = scmp.lt.s32.totalorder %s327_s28, %s327_s28 }
  0x2a   : > { %p2238_p10 = scmp.lt.s32.totalorder %s2229_s29, %s2229_s29 }
  0x2b   : > { %p2232_p0 = pnand %p2230_p13, %p2194_p12 }
  0x2c   : > { %p2239_p7 = por %p2238_p10, %p2237_p3 }
  0x2d   : > { %p2233_p5 = pneg %p2232_p0 }
  0x2e   : > { %2066 = dma.hbm_to_vmem [thread:$0]  (!%p2582_p11), %s2901_s2, 512, %s311_s25, [#allocation10], %s2879_s12, %s2879_s12, %s2880_s20  }
  0x2f   : > { %p2240_p9 = pnand %p2239_p7, %p2233_p5 }
  0x31   : > { %2243 = shalt.err (!%p2240_p9)
}
  0x32   : > { %s2902_s4 = sld [smem:[#allocation32_spill]]  ;;  %s2255_s25 = scalar_lea.vmem %s343_s30, 512 }
  0x33   : > { %p2256_p1 = scmp.ne.s32.totalorder %s343_s30, %s2255_s25  ;;  %p2263_p3 = scmp.lt.s32.totalorder %s343_s30, %s343_s30 }
  0x34   : > { %p2264_p5 = scmp.lt.s32.totalorder %s2255_s25, %s2255_s25 }
  0x35   : > { %p2258_p13 = pnand %p2256_p1, %p2194_p12 }
  0x36   : > { %p2265_p10 = por %p2264_p5, %p2263_p3 }
  0x37   : > { %p2259_p0 = pneg %p2258_p13 }
  0x38   : > { %2069 = dma.hbm_to_vmem [thread:$0]  (!%p2582_p11), %s2902_s4, 512, %s327_s28, [#allocation13], %s2879_s12, %s2879_s12, %s2880_s20  }
  0x39   : > { %p2266_p7 = pnand %p2265_p10, %p2259_p0 }
  0x3b   : > { %2269 = shalt.err (!%p2266_p7)
}
  0x3c   : > { %s2903_s6 = sld [smem:[#allocation33_spill]]  ;;  %s2455_s28 = smov [#allocation15]  }
  0x3d   : > { %s358_s27 = sshll.u32 %s2455_s28, 4  ;;  %s359_s27 = int_to_ptr.vmem [resolvable:$true] %s358_s27 }
  0x3e   : > { %s2281_s29 = scalar_lea.vmem %s359_s27, 512  ;;  %p2289_p0 = scmp.lt.s32.totalorder %s359_s27, %s359_s27 }
  0x3f   : > { %p2282_p1 = scmp.ne.s32.totalorder %s359_s27, %s2281_s29  ;;  %p2290_p3 = scmp.lt.s32.totalorder %s2281_s29, %s2281_s29 }
  0x41   : > { %p2284_p9 = pnand %p2282_p1, %p2194_p12  ;;  %p2291_p5 = por %p2290_p3, %p2289_p0 }
  0x42   : > { %2072 = dma.hbm_to_vmem [thread:$0]  (!%p2582_p11), %s2903_s6, 512, %s343_s30, [#allocation13], %s2879_s12, %s2879_s12, %s2880_s20  }
  0x43   : > { %p2285_p13 = pneg %p2284_p9 }
  0x45   : > { %p2292_p10 = pnand %p2291_p5, %p2285_p13 }
  0x47   : > { %2295 = shalt.err (!%p2292_p10)
}
  0x48   : > { %s2904_s8 = sld [smem:[#allocation34_spill]]  ;;  %s43_s25 = sadd.s32 1, %s2444_s17 }
  0x49   : > { %s52_s26 = sadd.s32 1, %s2436_s15  ;;  %p45_p12 = scmp.ge.s32.totalorder %s43_s25, 2 }
  0x4a   : > { %p59_p7 = scmp.ne.s32.totalorder %s2436_s15, %s2432_s14  ;;  %p60_p1 = scmp.eq.s32.totalorder %s2448_s18, 0 }
  0x4b   : > { %p2091_p9 = scmp.lt.s32.totalorder %s2448_s18, 2  ;;  %s2931_s25 = smov (%p45_p12, %s43_s25), 0 }
  0x4c   : > { %2905 = sst [smem:[#allocation28_spill]] %s2931_s25  ;;  %p61_p13 = por %p60_p1, %p59_p7 }
  0x4d   : > { %p2642_p0 = por %p285_p2, %p59_p7  ;;  %s47_s24 = ssub.s32 %s2444_s17, %s2931_s25 }
  0x4e   : > { %2075 = dma.hbm_to_vmem [thread:$0]  (!%p2582_p11), %s2904_s8, 512, %s359_s27, [#allocation16], %s2879_s12, %s2879_s12, %s2880_s20  }
  0x4f   : > { %s2649_s28 = sand.u32 1, %s2436_s15   ;;  %p50_p11 = scmp.eq.s32.totalorder %s47_s24, 0 }
  0x50   : > { %s1861_s27 = sshll.u32 %s2649_s28, 4  ;;  %s1909_s29 = sshll.u32 %s2444_s17, 8 }
  0x51   : > { %s2654_s30 = scalar_select %p50_p11, %s2436_s15, %s52_s26  }
  0x52   : > { %s2908_s0 = sld [smem:[#allocation30_spill]]  ;;  %s379_s2 = scalar_lea.vmem [#allocation6], %s1861_s27 }
  0x53   : > { %2907 = sst [smem:[#allocation29_spill]] %s2654_s30  ;;  %s388_s4 = sshll.u32 %s379_s2, 4  ;;  %s389_s4 = int_to_ptr.vmem [resolvable:$true] %s388_s4 }
  0x54   : > { %p2661_p2 = pnand %p2091_p9, %p61_p13  ;;  %s398_s8 = sand.u32 1, %s2448_s18  }
  0x55   : > { %s376_s24 = scalar_lea.sflag [#allocation7], %s2649_s28  ;;  %s2309_s26 = scalar_lea.vmem %s389_s4, 256 }
  0x56   : > { %p2298_p3 = pneg %p2661_p2  ;;  %p2310_p5 = scmp.ne.s32.totalorder %s389_s4, %s2309_s26 }
  0x57   : > { %s2456_s12 = smov [#allocation6]  }
  0x58   : > { %s387_s20 = scalar_lea.hbm %s2908_s0, %s1909_s29  ;;  %p2312_p10 = pnand %p2310_p5, %p2298_p3 }
  0x59   : > { %s2314_s2 = sshll.u32 %s2456_s12, 4  ;;  %s2315_s2 = int_to_ptr.vmem [resolvable:$false] %s2314_s2 }
  0x5a   : > { %p2313_p12 = pneg %p2312_p10  ;;  %s2316_s27 = scalar_lea.vmem %s2315_s2, 512 }
  0x5b   : > { %p2317_p7 = scmp.lt.s32.totalorder %s389_s4, %s2315_s2  ;;  %p2318_p1 = scmp.lt.s32.totalorder %s2316_s27, %s2309_s26 }
  0x5d   : > { %p2319_p9 = por %p2318_p1, %p2317_p7 }
  0x5f   : > { %p2320_p13 = pnand %p2319_p9, %p2313_p12 }
  0x61   : > { %2323 = shalt.err (!%p2320_p13)
}
  0x62   : > { %s2910_s29 = smov 8   ;;  %s2911_s11 = smov 128  }
  0x63   : > { %2079 = dma.hbm_to_vmem [thread:$0]  (!%p2661_p2), %s387_s20, 256, %s389_s4, %s376_s24, %s2911_s11, %s2911_s11, %s2910_s29  }
  0x64   : > { %s1864_s0 = sshll.u32 %s2649_s28, 3  ;;  %s1865_s25 = sshll.u32 %s2444_s17, 7 }
  0x65   : > { %s407_s15 = scalar_lea.hbm %s2867_s1, %s1865_s25  ;;  %s402_s2 = scalar_lea.vmem [#allocation9], %s1864_s0 }
  0x66   : > { %s409_s26 = sshll.u32 %s402_s2, 4  ;;  %s399_s27 = scalar_lea.sflag [#allocation10], %s398_s8  ;;  %s410_s26 = int_to_ptr.vmem [resolvable:$true] %s409_s26 }
  0x67   : > { %s2337_s18 = scalar_lea.vmem %s410_s26, 128  ;;  %s2457_s13 = smov [#allocation9]  }
  0x68   : > { %p2338_p11 = scmp.ne.s32.totalorder %s410_s26, %s2337_s18  ;;  %s2342_s10 = sshll.u32 %s2457_s13, 4  ;;  %s2343_s10 = int_to_ptr.vmem [resolvable:$false] %s2342_s10 }
  0x69   : > { %s2344_s4 = scalar_lea.vmem %s2343_s10, 256  ;;  %p2345_p12 = scmp.lt.s32.totalorder %s410_s26, %s2343_s10 }
  0x6a   : > { %p2340_p5 = pnand %p2338_p11, %p2298_p3  ;;  %p2346_p7 = scmp.lt.s32.totalorder %s2344_s4, %s2337_s18 }
  0x6c   : > { %p2341_p10 = pneg %p2340_p5  ;;  %p2347_p1 = por %p2346_p7, %p2345_p12 }
  0x6e   : > { %p2348_p9 = pnand %p2347_p1, %p2341_p10 }
  0x70   : > { %2351 = shalt.err (!%p2348_p9)
}
  0x71   : > { %2082 = dma.hbm_to_vmem [thread:$0]  (!%p2661_p2), %s407_s15, 128, %s410_s26, %s399_s27  }
  0x72   : > { %418 = sbr.rel (%p2573_p8) target bundleno = 1983 (0x7bf), region = 60  ;;  %s2690_s0 = sand.u32 (!%p2573_p8), 1, %s2432_s14  }
  0x73   : > { %s1867_s8 = sshll.u32 (!%p2573_p8), %s2690_s0, 4  ;;  %s421_s13 = scalar_lea.sflag (!%p2573_p8), [#allocation7], %s2690_s0 }
  0x74   : > { %s2696_s10 = scalar_lea.vmem (!%p2573_p8), [#allocation6], %s1867_s8 }
  0x77   : > { %2403 = dma.done.wait (%p2563_p4), %s421_s13, 256  }
  0x78   : > { %2405 = vsyncadd (%p2563_p4), %s421_s13, 4294967040  ;;  %s429_s6 = sand.u32 1, %s2554_s19   ;;  %s1868_s15 = sshll.u32 %s2690_s0, 3 }
  0x79   : > { %s430_s18 = scalar_lea.sflag [#allocation10], %s429_s6  ;;  %s433_s23 = scalar_lea.vmem [#allocation9], %s1868_s15 }
  0x7a   : > { %2407 = dma.done.wait (%p2563_p4), %s430_s18, 128  }
  0x7b   : > { %2409 = vsyncadd (%p2563_p4), %s430_s18, 4294967168  ;;  %p2912_p8 = scmp.eq.s32.totalorder %s2554_s19, 0 }
  0x7d   : > { %2411 = dma.done.wait (%p2912_p8), [#allocation10], 512   ;;  %p2913_p2 = pmov %p2912_p8 }
  0x7f   : > { %2413 = vsyncadd (%p2913_p2), [#allocation10], 4294966784  ;;  %p2914_p3 = pmov %p2913_p2 }
  0x80   : > { %p2915_p13 = pmov %p2913_p2 }
  0x81   : > { %2415 = dma.done.wait (%p2914_p3), [#allocation13], 1024  }
  0x82   : > { %2417 = vsyncadd (%p2915_p13), [#allocation13], 4294966272  ;;  %p2916_p11 = pmov %p2913_p2 }
  0x83   : > { %p2917_p5 = pmov %p2913_p2 }
  0x84   : > { %2419 = dma.done.wait (%p2916_p11), [#allocation16], 512  }
  0x85   : > { %2421 = vsyncadd (%p2917_p5), [#allocation16], 4294966784  ;;  %v2458_v0 = vmov 0.0   ;;  %vm2459_vm0 = vmmov 0   ;;  %v501_v1 = vld [vmem:[#allocation12 + $0x18] sm:$0xff]  ;;  %v500_v2 = vld [vmem:[#allocation12 + $0x10] sm:$0xff] }
  0x86   : > { %1957 = vmatprep.subr.mxu0 %v2458_v0  ;;  %1965 = vmatprep.mubr.msk.f32.mxu0 %vm2459_vm0, %v2458_v0  ;;  %v499_v3 = vld [vmem:[#allocation12 + $0x8] sm:$0xff]  ;;  %v498_v4 = vld [vmem:[#allocation12] sm:$0xff]  ;;  %v497_v5 = vld [vmem:[%s433_s23] sm:$0xff]  ;;  %vm509_vm1 = vcmask 261120   ;;  %vm766_vm2 = vcmask 64512   ;;  %s2460_s28 = smov 120  }
  0x87   : > { %1968 = vmatprep.subr.mxu1 %v2458_v0  ;;  %1976 = vmatprep.mubr.msk.f32.mxu1 %vm2459_vm0, %v2458_v0  ;;  %v671_v6 = vld [vmem:[#allocation11 + $0x18] sm:$0xff]  ;;  %v666_v7 = vld [vmem:[%s2696_s10] sm:$0xff]  ;;  %v669_v9 = vld [vmem:[#allocation11 + $0x8] sm:$0xff]  ;;  %s2461_s30 = smov 112   ;;  %s2462_s11 = smov 104   ;;  %vm1166_vm3 = vcmask 130112  }
  0x88   : > { %1958 = vmatpush3.msra.mxu0 %v501_v1  ;;  %v670_v8 = vld [vmem:[#allocation11 + $0x10] sm:$0xff]  ;;  %v668_v10 = vld [vmem:[#allocation11] sm:$0xff]  ;;  %v667_v11 = vld [vmem:[%s2696_s10 + $0x8] sm:$0xff]  ;;  %s2463_s12 = smov 8   ;;  %s2464_s2 = smov 16   ;;  %vm1378_vm4 = vcmask 195712  }
  0x89   : > { %1959 = vmatprep.subr.mxu0 %v2458_v0  ;;  %v586_v12 = vld [vmem:[#allocation14 + $0x18] sm:$0xff]  ;;  %v585_v13 = vld [vmem:[#allocation14 + $0x10] sm:$0xff]  ;;  %v584_v14 = vld [vmem:[#allocation14 + $0x8] sm:$0xff]  ;;  %s2465_s26 = smov 24   ;;  %vm1590_vm5 = vcmask 261312   ;;  %s490_s13 = scalar_lea.vmem [#allocation17], %s1867_s8 }
  0x8a   : > { %1960 = vmatpush3.msra.mxu0 %v500_v2  ;;  %1969 = vmatpush3.msra.mxu1 %v586_v12  ;;  %v583_v15 = vld [vmem:[#allocation14] sm:$0xff]  ;;  %s1705_s10 = sshll.u32 %s490_s13, 4  ;;  %s1910_s6 = sshll.u32 %s2440_s16, 8  ;;  %s2810_s10 = int_to_ptr.vmem [resolvable:$true] %s1705_s10 }
  0x8b   : > { %1961 = vmatprep.subr.mxu0 %v2458_v0  ;;  %1970 = vmatprep.subr.mxu1 %v2458_v0  ;;  %v1874_v16 = vld [vmem:[%s2871_s5] ss:$0 sm:$0xff]  ;;  %s2918_s23 = sld [smem:[#allocation35_spill]]  ;;  %s1690_s8 = scalar_lea.sflag [#allocation8], %s2690_s0 }
  0x8c   : > { %1962 = vmatpush3.msra.mxu0 %v499_v3  ;;  %1971 = vmatpush3.msra.mxu1 %v585_v13  ;;  %v1878_v20 = vld [vmem:[%s2869_s3] ss:$0 sm:$0xff]  ;;  %s2352_s21 = scalar_lea.vmem %s2810_s10, 256  ;;  %s2466_s16 = smov [#allocation17]  }
  0x8d   : > { %1963 = vmatprep.subr.mxu0 %v2458_v0  ;;  %1972 = vmatprep.subr.mxu1 %v2458_v0  ;;  %v1876_v28 = vld [vmem:[%s2873_s7] ss:$0 sm:$0xff]  ;;  %p2353_p4 = scmp.ne.s32.totalorder %s2810_s10, %s2352_s21  ;;  %s2356_s20 = sshll.u32 %s2466_s16, 4  ;;  %s2357_s20 = int_to_ptr.vmem [resolvable:$false] %s2356_s20 }
  0x8e   : > { %1964 = vmatpush3.msra.mxu0 %v498_v4  ;;  %1973 = vmatpush3.msra.mxu1 %v584_v14  ;;  %s2358_s25 = scalar_lea.vmem %s2357_s20, 512  ;;  %p2359_p7 = scmp.lt.s32.totalorder %s2810_s10, %s2357_s20 }
  0x8f   : > { %1966 = vmatmul.mubr.msk.f32.vlgmr.msra.gmra.mxu0 %vm509_vm1, %v497_v5  ;;  %1979 = vmatprep.subr.mxu0 %v671_v6  ;;  %p2354_p10 = pnand %p2353_p4, %p2642_p0  ;;  %p2360_p1 = scmp.lt.s32.totalorder %s2358_s25, %s2352_s21 }
  0x90   : > { %1980 = vmatpush3.msra.mxu0 %v671_v6  ;;  %1987 = vmatprep.mubr.msk.f32.mxu0 %vm509_vm1, %v666_v7 }
  0x91   : > { %1981 = vmatprep.subr.mxu0 %v670_v8  ;;  %1974 = vmatprep.subr.mxu1 %v2458_v0  ;;  %s2816_s19 = scalar_lea.hbm %s2918_s23, %s1910_s6  ;;  %p2355_p12 = pneg %p2354_p10 }
  0x92   : > { %1982 = vmatpush3.msra.mxu0 %v670_v8  ;;  %1975 = vmatpush3.msra.mxu1 %v583_v15  ;;  %p2361_p9 = por %p2360_p1, %p2359_p7 }
  0x93   : > { %1983 = vmatprep.subr.mxu0 %v669_v9  ;;  %1977 = vmatmul.mubr.msk.f32.vlgmr.msra.gmra.mxu1 %vm509_vm1, %v497_v5 }
  0x94   : > { %1984 = vmatpush3.msra.mxu0 %v669_v9  ;;  %p2362_p8 = pnand %p2361_p9, %p2355_p12 }
  0x95   : > { %1985 = vmatprep.subr.mxu0 %v668_v10 }
  0x96   : > { %1986 = vmatpush3.msra.mxu0 %v668_v10 }
  0x97   : > { %1988 = vmatmul.mubr.msk.f32.vlgmr.msra.gmra.mxu0 %vm509_vm1, %v667_v11 }
 0x14f   : > { %v579_v17 = vpop.f32.mrf.mxu0 }
 0x150   : > { %v580_v18 = vadd.f32 %v1874_v16, %v579_v17 }
 0x151   : > { %v1967_v19 = vpop.f32.mrf.mxu0 }
 0x152   : > { %664 = vst.msk [vmem:[#allocation3] sm:$0xff] %vm509_vm1, %v580_v18 }
 0x153   : > { %v660_v29 = vpop.f32.mrf.mxu1 }
 0x154   : > { %v661_v30 = vadd.f32 %v1876_v28, %v660_v29 }
 0x155   : > { %v1978_v31 = vpop.f32.mrf.mxu1 }
 0x156   : > { %665 = vst.msk [vmem:[#allocation4] sm:$0xff] %vm509_vm1, %v661_v30 }
 0x157   : > { %v1989_v21 = vpop.f32.mrf.mxu0 }
 0x158   : > { %v758_v22 = vadd.f32 %v1989_v21, %v1878_v20 }
 0x159   : > { %v752_v23 = vpop.f32.mrf.mxu0  ;;  %v765_v24 = vld [vmem:[#allocation3] sm:$0xff] }
 0x15a   : > { %762 = vst.msk [vmem:[#allocation2 + $0x8] sm:$0xff] %vm509_vm1, %v758_v22  ;;  %v753_v25 = vadd.f32 %v1878_v20, %v752_v23  ;;  %1990 = vmatprep.subr.msk.mxu1 %vm766_vm2, %v765_v24 }
 0x15b   : > { %1991 = vmatpush3.xpose.msk.msra.mxu1 %vm766_vm2, %v765_v24 }
 0x15c   : > { %761 = vst.msk [vmem:[#allocation2] sm:$0xff] %vm509_vm1, %v753_v25 }
 0x15d   : > { %v2746_v32 = vld [vmem:[#allocation4] sm:$0xff] }
 0x15e   : > { %1995 = vmatprep.subr.mxu1 %v2746_v32 }
 0x161   : > { %v764_v27 = vld [vmem:[#allocation2 + $0x8] sm:$0xff] }
 0x163   : > { %v957_v26 = vld [vmem:[#allocation2] sm:$0xff] }
 0x164   : > { %962 = vrot.lane.b32.xlu1 %v957_v26, %s2460_s28  ;;  %1992 = vmatprep.mubr.msk.f32.mxu1 %vm766_vm2, %v957_v26 }
 0x165   : > { %1993 = vmatmul.mubr.msk.f32.vlgmr.msra.gmra.mxu1 %vm766_vm2, %v764_v27 }
 0x166   : > { %1996 = vmatpush3.msra.mxu1 %v2746_v32 }
 0x168   : > { %964 = vrot.lane.b32.xlu1 %v764_v27, %s2460_s28 }
 0x16c   : > { %1179 = vrot.lane.b32.xlu1 %v765_v24, %s2461_s30 }
 0x1d6   : > { %v963_v33 = vpop.permute.xlu1 %962 }
 0x1da   : > { %v965_v34 = vpop.permute.xlu1 %964 }
 0x1de   : > { %v1180_v35 = vpop.permute.xlu1 %1179 }
 0x1df   : > { %2010 = vmatprep.subr.msk.mxu0 %vm766_vm2, %v1180_v35 }
 0x1e0   : > { %2011 = vmatpush3.xpose.msk.msra.mxu0 %vm766_vm2, %v1180_v35 }
 0x225   : > { %v1994_v36 = vpop.f32.mrf.mxu1 }
 0x226   : > { %v854_v39 = vsel %vm766_vm2, %v1994_v36, -inf }
 0x227   : > { %v842_v37 = vpop.f32.mrf.mxu1 }
 0x228   : > { %v851_v38 = vsel %vm766_vm2, %v842_v37, -inf }
 0x229   : > { %852 = vmax.xlane.f32.xlu0 %v851_v38 }
 0x22d   : > { %855 = vmax.xlane.f32.xlu0 %v854_v39 }
 0x243   : > { %967 = vrot.lane.b32.xlu0 %v765_v24, %s2460_s28 }
 0x247   : > { %1174 = vrot.lane.b32.xlu0 %v957_v26, %s2461_s30 }
 0x24b   : > { %1391 = vrot.lane.b32.xlu0 %v765_v24, %s2462_s11 }
 0x24f   : > { %1388 = vrot.lane.b32.xlu0 %v764_v27, %s2462_s11 }
 0x2b2   : > { %v853_v40 = vpop.xlane.xlu0 %852 }
 0x2b3   : > { %v857_v41 = vsub.f32 %v842_v37, %v853_v40 }
 0x2b5   : > { %v859_v44 = vmul.f32 1.442695, %v857_v41 }
 0x2b6   : > { %v856_v42 = vpop.xlane.xlu0 %855 }
 0x2b7   : > { %v858_v43 = vsub.f32 %v1994_v36, %v856_v42 }
 0x2b9   : > { %v861_v45 = vmul.f32 1.442695, %v858_v43 }
 0x2ba   : > { %v968_v46 = vpop.permute.xlu0 %967 }
 0x2bb   : > { %2160 = vpow2.f32 %v861_v45  ;;  %2000 = vmatprep.subr.msk.mxu1 %vm766_vm2, %v968_v46 }
 0x2bc   : > { %2162 = vpow2.f32 %v859_v44 }
 0x2be   : > { %v1175_v47 = vpop.permute.xlu0 %1174 }
 0x2bf   : > { %2012 = vmatprep.mubr.msk.f32.mxu0 %vm766_vm2, %v1175_v47 }
 0x2c2   : > { %v1392_v48 = vpop.permute.xlu0 %1391 }
 0x2c3   : > { %2020 = vmatprep.subr.msk.mxu0 %vm766_vm2, %v1392_v48 }
 0x2c6   : > { %v1389_v57 = vpop.permute.xlu0 %1388 }
 0x2c8   : > { %v2161_v49 = vpop.eup %2160 }
 0x2c9   : > { %v866_v50 = vsel %vm766_vm2, %v2161_v49, 0.0  ;;  %v2163_v51 = vpop.eup %2162 }
 0x2ca   : > { %867 = vadd.xlane.f32.xlu1 %v866_v50  ;;  %v863_v52 = vsel %vm766_vm2, %v2163_v51, 0.0 }
 0x2ce   : > { %864 = vadd.xlane.f32.xlu1 %v863_v52 }
 0x2df   : > { %1176 = vrot.lane.b32.xlu1 %v764_v27, %s2461_s30 }
 0x2e3   : > { %1386 = vrot.lane.b32.xlu1 %v957_v26, %s2462_s11 }
 0x353   : > { %v868_v53 = vpop.xlane.xlu1 %867 }
 0x354   : > { %2164 = vrcp.f32 %v868_v53 }
 0x357   : > { %v865_v54 = vpop.xlane.xlu1 %864 }
 0x358   : > { %2166 = vrcp.f32 %v865_v54 }
 0x35b   : > { %v1177_v55 = vpop.permute.xlu1 %1176 }
 0x35c   : > { %2013 = vmatmul.mubr.msk.f32.vlgmr.msra.gmra.mxu0 %vm766_vm2, %v1177_v55 }
 0x35d   : > { %2021 = vmatpush3.xpose.msk.msra.mxu0 %vm766_vm2, %v1392_v48 }
 0x35f   : > { %v1387_v56 = vpop.permute.xlu1 %1386 }
 0x360   : > { %2022 = vmatprep.mubr.msk.f32.mxu0 %vm766_vm2, %v1387_v56 }
 0x361   : > { %2023 = vmatmul.mubr.msk.f32.vlgmr.msra.gmra.mxu0 %vm766_vm2, %v1389_v57  ;;  %v2165_v58 = vpop.eup %2164 }
 0x362   : > { %v872_v61 = vmul.f32 %v2165_v58, %v2161_v49 }
 0x365   : > { %v2167_v59 = vpop.eup %2166 }
 0x366   : > { %v871_v60 = vmul.f32 %v2167_v59, %v2163_v51 }
 0x368   : > { %1997 = vmatprep.mubr.msk.f32.mxu1 %vm766_vm2, %v871_v60 }
 0x369   : > { %1998 = vmatmul.mubr.msk.f32.vlgmr.msra.gmra.mxu1 %vm766_vm2, %v872_v61 }
 0x36a   : > { %2001 = vmatpush3.xpose.msk.msra.mxu1 %vm766_vm2, %v968_v46  ;;  %2002 = vmatprep.mubr.msk.f32.mxu1 %vm766_vm2, %v963_v33 }
 0x36d   : > { %2003 = vmatmul.mubr.msk.f32.vlgmr.msra.gmra.mxu1 %vm766_vm2, %v965_v34 }
 0x41c   : > { %v2014_v62 = vpop.f32.mrf.mxu0 }
 0x41d   : > { %v1265_v10 = vsel %vm766_vm2, %v2014_v62, -inf }
 0x41e   : > { %v1253_v63 = vpop.f32.mrf.mxu0 }
 0x41f   : > { %v1262_v8 = vsel %vm766_vm2, %v1253_v63, -inf }
 0x421   : > { %v2024_v2 = vpop.f32.mrf.mxu0 }
 0x422   : > { %v1477_v11 = vsel %vm766_vm2, %v2024_v2, -inf }
 0x423   : > { %v1465_v7 = vpop.f32.mrf.mxu0 }
 0x424   : > { %v1474_v9 = vsel %vm766_vm2, %v1465_v7, -inf }
 0x429   : > { %v1999_v0 = vpop.f32.mrf.mxu1 }
 0x42a   : > { %956 = vst.msk [vmem:[#allocation5 + $0x8] sm:$0xff] %vm766_vm2, %v1999_v0  ;;  %v1598_v0 = vld [vmem:[#allocation15 + $0x18] sm:$0xff] }
 0x42b   : > { %v946_v1 = vpop.f32.mrf.mxu1  ;;  %2030 = vmatprep.subr.mxu0 %v1598_v0 }
 0x42c   : > { %955 = vst.msk [vmem:[#allocation5] sm:$0xff] %vm766_vm2, %v946_v1  ;;  %v1597_v1 = vld [vmem:[#allocation15 + $0x10] sm:$0xff]  ;;  %2031 = vmatpush3.msra.mxu0 %v1598_v0 }
 0x42d   : > { %v2004_v3 = vpop.f32.mrf.mxu1  ;;  %2032 = vmatprep.subr.mxu0 %v1597_v1 }
 0x42e   : > { %v1053_v4 = vsel %vm766_vm2, %v2004_v3, -inf  ;;  %2033 = vmatpush3.msra.mxu0 %v1597_v1 }
 0x42f   : > { %1054 = vmax.xlane.f32.xlu0 %v1053_v4  ;;  %v1041_v5 = vpop.f32.mrf.mxu1 }
 0x430   : > { %v1050_v6 = vsel %vm766_vm2, %v1041_v5, -inf }
 0x431   : > { %1051 = vmax.xlane.f32.xlu1 %v1050_v6 }
 0x433   : > { %1263 = vmax.xlane.f32.xlu0 %v1262_v8 }
 0x435   : > { %1475 = vmax.xlane.f32.xlu1 %v1474_v9 }
 0x437   : > { %1266 = vmax.xlane.f32.xlu0 %v1265_v10 }
 0x43b   : > { %1478 = vmax.xlane.f32.xlu0 %v1477_v11 }
 0x4b8   : > { %v1055_v12 = vpop.xlane.xlu0 %1054 }
 0x4b9   : > { %v1057_v22 = vsub.f32 %v2004_v3, %v1055_v12  ;;  %v1596_v3 = vld [vmem:[#allocation15 + $0x8] sm:$0xff] }
 0x4ba   : > { %v1052_v13 = vpop.xlane.xlu1 %1051  ;;  %2034 = vmatprep.subr.mxu0 %v1596_v3 }
 0x4bb   : > { %v1060_v26 = vmul.f32 1.442695, %v1057_v22  ;;  %v1056_v39 = vsub.f32 %v1041_v5, %v1052_v13  ;;  %v1595_v5 = vld [vmem:[#allocation15] sm:$0xff]  ;;  %2035 = vmatpush3.msra.mxu0 %v1596_v3 }
 0x4bc   : > { %v1264_v14 = vpop.xlane.xlu0 %1263  ;;  %2036 = vmatprep.subr.mxu0 %v1595_v5 }
 0x4bd   : > { %v1268_v15 = vsub.f32 %v1253_v63, %v1264_v14  ;;  %v1058_v40 = vmul.f32 1.442695, %v1056_v39  ;;  %2037 = vmatpush3.msra.mxu0 %v1595_v5 }
 0x4be   : > { %v1476_v16 = vpop.xlane.xlu1 %1475 }
 0x4bf   : > { %v1270_v17 = vmul.f32 1.442695, %v1268_v15  ;;  %v1480_v18 = vsub.f32 %v1465_v7, %v1476_v16 }
 0x4c0   : > { %v1267_v19 = vpop.xlane.xlu0 %1266 }
 0x4c1   : > { %2168 = vpow2.f32 %v1270_v17  ;;  %v1482_v20 = vmul.f32 1.442695, %v1480_v18  ;;  %v1269_v21 = vsub.f32 %v2014_v62, %v1267_v19  ;;  %v1901_v17 = vld [vmem:[%s2875_s9] ss:$0 sm:$0xff] }
 0x4c3   : > { %2170 = vpow2.f32 %v1482_v20  ;;  %v1272_v23 = vmul.f32 1.442695, %v1269_v21 }
 0x4c4   : > { %v1479_v24 = vpop.xlane.xlu0 %1478 }
 0x4c5   : > { %2172 = vpow2.f32 %v1272_v23  ;;  %v1481_v25 = vsub.f32 %v2024_v2, %v1479_v24 }
 0x4c7   : > { %v1484_v27 = vmul.f32 1.442695, %v1481_v25 }
 0x4c9   : > { %2174 = vpow2.f32 %v1484_v27 }
 0x4ca   : > { %2176 = vpow2.f32 %v1060_v26 }
 0x4cb   : > { %2178 = vpow2.f32 %v1058_v40 }
 0x4ce   : > { %v2169_v28 = vpop.eup %2168 }
 0x4cf   : > { %v1274_v29 = vsel %vm766_vm2, %v2169_v28, 0.0 }
 0x4d0   : > { %v2171_v30 = vpop.eup %2170  ;;  %1275 = vadd.xlane.f32.xlu1 %v1274_v29 }
 0x4d1   : > { %v1486_v33 = vsel %vm766_vm2, %v2171_v30, 0.0 }
 0x4d2   : > { %v2173_v31 = vpop.eup %2172 }
 0x4d3   : > { %v1277_v34 = vsel %vm766_vm2, %v2173_v31, 0.0 }
 0x4d4   : > { %1487 = vadd.xlane.f32.xlu1 %v1486_v33  ;;  %1278 = vadd.xlane.f32.xlu0 %v1277_v34 }
 0x4d6   : > { %v2175_v35 = vpop.eup %2174 }
 0x4d7   : > { %v1489_v36 = vsel %vm766_vm2, %v2175_v35, 0.0  ;;  %v2177_v37 = vpop.eup %2176 }
 0x4d8   : > { %1490 = vadd.xlane.f32.xlu0 %v1489_v36  ;;  %v1065_v38 = vsel %vm766_vm2, %v2177_v37, 0.0  ;;  %v2179_v41 = vpop.eup %2178 }
 0x4d9   : > { %v1062_v42 = vsel %vm766_vm2, %v2179_v41, 0.0 }
 0x4dc   : > { %1066 = vadd.xlane.f32.xlu0 %v1065_v38 }
 0x4e5   : > { %1074 = vrot.lane.b32.xlu1 %v2746_v32, %s2460_s28 }
 0x4f2   : > { %1286 = vrot.lane.b32.xlu0 %v2746_v32, %s2461_s30 }
 0x509   : > { %1063 = vadd.xlane.f32.xlu1 %v1062_v42 }
 0x51a   : > { %1498 = vrot.lane.b32.xlu1 %v2746_v32, %s2462_s11 }
 0x559   : > { %v1276_v43 = vpop.xlane.xlu1 %1275 }
 0x55a   : > { %2180 = vrcp.f32 %v1276_v43 }
 0x55d   : > { %v1488_v44 = vpop.xlane.xlu1 %1487  ;;  %v1279_v45 = vpop.xlane.xlu0 %1278 }
 0x561   : > { %v1075_v46 = vpop.permute.xlu1 %1074  ;;  %v1491_v47 = vpop.xlane.xlu0 %1490 }
 0x562   : > { %2005 = vmatprep.subr.mxu1 %v1075_v46 }
 0x563   : > { %2006 = vmatpush3.msra.mxu1 %v1075_v46 }
 0x565   : > { %v1067_v48 = vpop.xlane.xlu0 %1066 }
 0x566   : > { %2182 = vrcp.f32 %v1067_v48 }
 0x567   : > { %v2181_v51 = vpop.eup %2180 }
 0x568   : > { %v1282_v56 = vmul.f32 %v2181_v51, %v2169_v28 }
 0x569   : > { %v1287_v49 = vpop.permute.xlu0 %1286 }
 0x56a   : > { %2015 = vmatprep.subr.mxu1 %v1287_v49 }
 0x573   : > { %v2183_v52 = vpop.eup %2182 }
 0x574   : > { %v1071_v54 = vmul.f32 %v2183_v52, %v2177_v37 }
 0x592   : > { %v1064_v50 = vpop.xlane.xlu1 %1063 }
 0x593   : > { %2184 = vrcp.f32 %v1064_v50 }
 0x594   : > { %2186 = vrcp.f32 %v1279_v45 }
 0x595   : > { %2188 = vrcp.f32 %v1488_v44 }
 0x596   : > { %2190 = vrcp.f32 %v1491_v47  ;;  %v1499_v58 = vpop.permute.xlu1 %1498 }
 0x5a0   : > { %v2185_v32 = vpop.eup %2184 }
 0x5a1   : > { %v1070_v53 = vmul.f32 %v2185_v32, %v2179_v41  ;;  %v2187_v55 = vpop.eup %2186 }
 0x5a2   : > { %v2189_v57 = vpop.eup %2188  ;;  %v1283_v59 = vmul.f32 %v2187_v55, %v2173_v31 }
 0x5a3   : > { %2007 = vmatprep.mubr.msk.f32.mxu1 %vm766_vm2, %v1070_v53  ;;  %v2191_v60 = vpop.eup %2190  ;;  %v1494_v61 = vmul.f32 %v2189_v57, %v2171_v30 }
 0x5a4   : > { %2008 = vmatmul.mubr.msk.f32.vlgmr.msra.gmra.mxu1 %vm766_vm2, %v1071_v54  ;;  %v1495_v62 = vmul.f32 %v2191_v60, %v2175_v35 }
 0x5a5   : > { %2016 = vmatpush3.msra.mxu1 %v1287_v49  ;;  %2017 = vmatprep.mubr.msk.f32.mxu1 %vm766_vm2, %v1282_v56 }
 0x5a6   : > { %2025 = vmatprep.subr.mxu1 %v1499_v58 }
 0x5a8   : > { %2018 = vmatmul.mubr.msk.f32.vlgmr.msra.gmra.mxu1 %vm766_vm2, %v1283_v59 }
 0x5a9   : > { %2026 = vmatpush3.msra.mxu1 %v1499_v58  ;;  %2027 = vmatprep.mubr.msk.f32.mxu1 %vm766_vm2, %v1494_v61 }
 0x5ac   : > { %2028 = vmatmul.mubr.msk.f32.vlgmr.msra.gmra.mxu1 %vm766_vm2, %v1495_v62 }
 0x664   : > { %v2009_v63 = vpop.f32.mrf.mxu1 }
 0x665   : > { %1162 = vrot.lane.b32.xlu1 %v2009_v63, %s2463_s12 }
 0x666   : > { %v1149_v2 = vpop.f32.mrf.mxu1 }
 0x668   : > { %v2019_v4 = vpop.f32.mrf.mxu1 }
 0x669   : > { %1160 = vrot.lane.b32.xlu1 %v1149_v2, %s2463_s12 }
 0x66a   : > { %v1361_v6 = vpop.f32.mrf.mxu1 }
 0x66b   : > { %1372 = vrot.lane.b32.xlu0 %v1361_v6, %s2464_s2 }
 0x66c   : > { %v2029_v7 = vpop.f32.mrf.mxu1 }
 0x66d   : > { %1374 = vrot.lane.b32.xlu1 %v2019_v4, %s2464_s2 }
 0x66e   : > { %v1573_v8 = vpop.f32.mrf.mxu1 }
 0x66f   : > { %1584 = vrot.lane.b32.xlu0 %v1573_v8, %s2465_s26 }
 0x671   : > { %1586 = vrot.lane.b32.xlu1 %v2029_v7, %s2465_s26 }
 0x6d7   : > { %v1163_v9 = vpop.permute.xlu1 %1162 }
 0x6d8   : > { %1168 = vst.msk [vmem:[#allocation5 + $0x8] sm:$0xff] %vm1166_vm3, %v1163_v9 }
 0x6db   : > { %v1161_v10 = vpop.permute.xlu1 %1160 }
 0x6dc   : > { %1167 = vst.msk [vmem:[#allocation5] sm:$0xff] %vm1166_vm3, %v1161_v10 }
 0x6dd   : > { %v1373_v11 = vpop.permute.xlu0 %1372 }
 0x6de   : > { %1379 = vst.msk [vmem:[#allocation5] sm:$0xff] %vm1378_vm4, %v1373_v11 }
 0x6df   : > { %v1375_v12 = vpop.permute.xlu1 %1374 }
 0x6e0   : > { %1380 = vst.msk [vmem:[#allocation5 + $0x8] sm:$0xff] %vm1378_vm4, %v1375_v12 }
 0x6e1   : > { %v1585_v13 = vpop.permute.xlu0 %1584 }
 0x6e2   : > { %1591 = vst.msk [vmem:[#allocation5] sm:$0xff] %vm1590_vm5, %v1585_v13 }
 0x6e3   : > { %v1587_v14 = vpop.permute.xlu1 %1586 }
 0x6e4   : > { %1592 = vst.msk [vmem:[#allocation5 + $0x8] sm:$0xff] %vm1590_vm5, %v1587_v14 }
 0x6e9   : > { %v1593_v15 = vld [vmem:[#allocation5] sm:$0xff] }
 0x6ea   : > { %2038 = vmatprep.mubr.msk.f32.mxu0 %vm509_vm1, %v1593_v15 }
 0x6eb   : > { %v1594_v16 = vld [vmem:[#allocation5 + $0x8] sm:$0xff] }
 0x6ec   : > { %2039 = vmatmul.mubr.msk.f32.vlgmr.msra.gmra.mxu0 %vm509_vm1, %v1594_v16 }
 0x7ac   : > { %v2040_v18 = vpop.f32.mrf.mxu0 }
 0x7ad   : > { %v1684_v19 = vadd.f32 %v2040_v18, %v1901_v17 }
 0x7ae   : > { %v1678_v20 = vpop.f32.mrf.mxu0 }
 0x7af   : > { %1688 = vst.msk [vmem:[%s490_s13 + $0x8] sm:$0xff] %vm509_vm1, %v1684_v19  ;;  %v1679_v21 = vadd.f32 %v1901_v17, %v1678_v20 }
 0x7b1   : > { %1687 = vst.msk [vmem:[%s490_s13] sm:$0xff] %vm509_vm1, %v1679_v21 }
 0x7b2   : > { %2365 = shalt.err (!%p2362_p8)
}
 0x7b3   : > { %s2366_s28 = scalar_lea.hbm %s2816_s19, 256  ;;  %s2370_s29 = scalar_lea.hbm %s2918_s23, 512 }
 0x7b4   : > { %p2367_p2 = scmp.ne.s32.totalorder %s2816_s19, %s2366_s28  ;;  %p2371_p11 = scmp.lt.s32.totalorder %s2816_s19, %s2918_s23 }
 0x7b5   : > { %p2372_p5 = scmp.lt.s32.totalorder %s2370_s29, %s2366_s28 }
 0x7b6   : > { %p2368_p3 = pnand %p2367_p2, %p2642_p0 }
 0x7b7   : > { %p2373_p4 = por %p2372_p5, %p2371_p11 }
 0x7b8   : > { %p2369_p13 = pneg %p2368_p3 }
 0x7ba   : > { %p2374_p10 = pnand %p2373_p4, %p2369_p13 }
 0x7bc   : > { %2377 = shalt.err (!%p2374_p10)
}
 0x7bd   : > { %s2467_s26 = smov 128  }
 0x7be   : > { %2061 = dma.vmem_to_hbm [thread:$0]  (%p2642_p0), %s2810_s10, 256, %s2816_s19, %s1690_s8, %s2467_s26, %s2467_s26, %s2463_s12  }
 0x7bf PF: > { %s2919_s27 = sld [smem:[#allocation24_spill]] }
 0x7c0   : > { %s2921_s13 = sld [smem:[#allocation26_spill]] }
 0x7c5   : > { %s1720_s6 = sand.u32 1, %s2919_s27  }
 0x7c6   : > { %p2922_p12 = scmp.ge.s32.totalorder %s2921_s13, 2  ;;  %s1721_s15 = scalar_lea.sflag [#allocation8], %s1720_s6 }
 0x7c8   : > { %p2084_p7 = pnand %p2922_p12, %p2568_p6 }
 0x7ca   : > { %p2085_p1 = pneg %p2084_p7 }
 0x7cc   : > { %2423 = dma.done.wait (%p2085_p1), %s1721_s15, 256  }
 0x7cd   : > { %2425 = vsyncadd (%p2085_p1), %s1721_s15, 4294967040  ;;  %s31_s18 = sadd.s32 1, %s2921_s13   ;;  %s2923_s22 = sld [smem:[#allocation25_spill]] }
 0x7ce   : > { %p28_p9 = scmp.ge.s32.totalorder %s31_s18, 4   ;;  %s2924_s15 = sld [smem:[#allocation29_spill]] }
 0x7cf   : > { %s2925_s0 = sld [smem:[#allocation28_spill]]  ;;  %s2926_s13 = smov %s2432_s14 }
 0x7d0   : > { %s2928_s16 = smov %s2444_s17 }
 0x7d1   :  { %30 = sbr.rel (!%p28_p9) target bundleno = 17 (0x11), region = 138 }
 0x7d3   : > { %s2927_s14 = smov %s2923_s22 }
 0x7d5   : > { %s2929_s17 = smov %s2925_s0 }
 0x7d6   :  { %1726 = vsyncpa [#allocation7], 1 }
 0x7d7   :  { %1728 = vsyncpa [#allocation7 + $0x1], 1 }
 0x7d8   :  { %1729 = vsyncpa [#allocation10], 1 }
 0x7d9   :  { %1731 = vsyncpa [#allocation10 + $0x1], 1 }
 0x7da   :  { %1732 = vsyncpa [#allocation13], 1 }
 0x7db   :  { %1733 = vsyncpa [#allocation16], 1 }
 0x7dc   :  { %1734 = vsyncpa [#allocation8], 1 }
 0x7dd   :  { %1736 = vsyncpa [#allocation8 + $0x1], 1 }

</bundles_post_ra>
